<compile_context>
chip_gen: v6e
topology: v6e:2x2x1
jax: 0.10.0
libtpu: 0.0.40
codegen_flags: <defaults>
</compile_context>

<pallas_src>
import jax
import jax.numpy as jnp
from jax.experimental import pallas as pl
from jax.experimental.pallas import tpu as pltpu


def _linear_kernel(x_ref, w_ref, b_ref, o_ref):
    # x_ref: (TB, 512) tile, w_ref: (512, 10), b_ref: (1, 10) f32, o_ref: (TB, 10)
    acc = jnp.dot(x_ref[...], w_ref[...], preferred_element_type=jnp.float32)
    o_ref[...] = (acc + b_ref[...]).astype(o_ref.dtype)


def _pallas_linear(x, w_t, b, tb, out_dtype):
    B, K = x.shape
    _, N = w_t.shape
    grid = (pl.cdiv(B, tb),)  # ragged B handled by a masked partial last block

    flops = 2 * B * K * N
    bytes_accessed = (
        B * K * x.dtype.itemsize          # x read (dominant stream)
        + K * N * w_t.dtype.itemsize      # W read (once, resident)
        + N * 4                           # b read
        + B * N * jnp.dtype(out_dtype).itemsize  # out write
    )

    return pl.pallas_call(
        _linear_kernel,
        out_shape=jax.ShapeDtypeStruct((B, N), out_dtype),
        grid_spec=pl.GridSpec(
            grid=grid,
            in_specs=[
                pl.BlockSpec((tb, K), lambda i: (i, 0)),   # x: tiled along batch
                pl.BlockSpec((K, N), lambda i: (0, 0)),    # W: resident in VMEM
                pl.BlockSpec((1, N), lambda i: (0, 0)),    # b: resident in VMEM
            ],
            out_specs=pl.BlockSpec((tb, N), lambda i: (i, 0)),
        ),
        compiler_params=pltpu.CompilerParams(
            dimension_semantics=("parallel",),   # independent batch tiles
        ),
        cost_estimate=pl.CostEstimate(
            flops=flops, transcendentals=0, bytes_accessed=bytes_accessed),
    )(x, w_t, b)


def vfl_server_forward(x, w_t, b, *, block_rows=2048, min_pallas_batch=128,
                       cast_to_bf16=True):
    """Forward of VFL_Server: classifier(x) = x @ w_t + b.

    x:   (B, 512) float32
    w_t: (512, 10) float32   (transpose of the PyTorch (10, 512) weight)
    b:   (1, 10)  float32
    returns (B, 10) float32
    """
    B, K = x.shape
    Kw, N = w_t.shape
    assert K == Kw and b.shape == (1, N)
    out_dtype = jnp.float32

    # Tiny batch: per-step overhead dwarfs the work; let XLA fuse the dot.
    if B < min_pallas_batch:
        if cast_to_bf16:
            acc = jnp.dot(x.astype(jnp.bfloat16), w_t.astype(jnp.bfloat16),
                          preferred_element_type=jnp.float32)
        else:
            acc = jnp.dot(x, w_t, preferred_element_type=jnp.float32)
        return (acc + b).astype(out_dtype)

    if cast_to_bf16:
        # Halve HBM bytes on the dominant x stream; keep f32 accumulate in-kernel.
        x = x.astype(jnp.bfloat16)
        w_t = w_t.astype(jnp.bfloat16)
    b = b.astype(jnp.float32)

    # Batch tile: multiple of 8 (sublane), capped by B and block_rows.
    tb = min(block_rows, B)
    tb = max(8, (tb // 8) * 8)

    return _pallas_linear(x, w_t, b, tb, out_dtype)


if __name__ == "__main__":
    key = jax.random.PRNGKey(0)
    k_x, k_w, k_b = jax.random.split(key, 3)

    IN, OUT = 512, 10

    # Deterministic parameter init (mimics PyTorch Linear default uniform bounds).
    bound = 1.0 / jnp.sqrt(jnp.float32(IN))
    w = jax.random.uniform(k_w, (OUT, IN), jnp.float32, -bound, bound)  # PyTorch (out, in)
    b = jax.random.uniform(k_b, (OUT,), jnp.float32, -bound, bound)
    w_t = w.T
    b2 = b.reshape(1, OUT)

    def ref_bf16(xv):
        xb = xv.astype(jnp.bfloat16).astype(jnp.float32)
        wb = w_t.astype(jnp.bfloat16).astype(jnp.float32)
        return xb @ wb + b2

    # --- Ragged batch: B=300 with 128-row tiles -> 3 grid steps, masked partial
    # last block (exercises the no-pad path).
    B = 300
    x = jax.random.normal(k_x, (B, IN), jnp.float32)
    out = jax.block_until_ready(vfl_server_forward(x, w_t, b2, block_rows=128))
    assert out.shape == (B, OUT) and out.dtype == jnp.float32
    assert jnp.allclose(out, ref_bf16(x), atol=1e-4, rtol=1e-4)
    assert jnp.allclose(out, x @ w.T + b, atol=5e-2, rtol=5e-2)  # vs f32 PyTorch ref

    # --- Exact-multiple batch (pipelined tiles, no partial block).
    B2 = 256
    x2 = jax.random.normal(k_x, (B2, IN), jnp.float32)
    out2 = jax.block_until_ready(vfl_server_forward(x2, w_t, b2, block_rows=128))
    assert out2.shape == (B2, OUT)
    assert jnp.allclose(out2, ref_bf16(x2), atol=1e-4, rtol=1e-4)

    # --- f32 (no bf16 cast) path: exact PyTorch numerics.
    out3 = jax.block_until_ready(
        vfl_server_forward(x2, w_t, b2, block_rows=128, cast_to_bf16=False))
    assert jnp.allclose(out3, x2 @ w.T + b, atol=1e-5, rtol=1e-5)

    # --- Tiny-batch fallback path (B=8 -> fused XLA dot, same semantics).
    x_small = jax.random.normal(k_x, (8, IN), jnp.float32)
    out_small = jax.block_until_ready(vfl_server_forward(x_small, w_t, b2))
    assert out_small.shape == (8, OUT)
    assert jnp.allclose(out_small, ref_bf16(x_small), atol=1e-4, rtol=1e-4)

    print("KERNEL_OK")
</pallas_src>

<mosaic_0001>
module attributes {stable_mosaic.version = 11 : i64} {
  func.func @_linear_kernel(%arg0: i32, %arg1: memref<128x512xbf16, #tpu.memory_space<vmem>>, %arg2: memref<512x10xbf16, #tpu.memory_space<vmem>>, %arg3: memref<1x10xf32, #tpu.memory_space<vmem>>, %arg4: memref<128x10xf32, #tpu.memory_space<vmem>>) attributes {dimension_semantics = [#tpu.dimension_semantics<parallel>], iteration_bounds = array<i64: 3>, scalar_prefetch = 0 : i64, scratch_operands = 0 : i64, tpu.core_type = #tpu.core_type<tc>, window_params = [{transform_indices = @transform_0, window_bounds = array<i64: 128, 512>}, {pipeline_mode = #tpu.pipeline_mode<synchronous>, transform_indices = @transform_1, window_bounds = array<i64: 512, 10>}, {pipeline_mode = #tpu.pipeline_mode<synchronous>, transform_indices = @transform_2, window_bounds = array<i64: 1, 10>}, {transform_indices = @transform_3, window_bounds = array<i64: 128, 10>}]} {
    %c0 = arith.constant 0 : index
    %c0_0 = arith.constant 0 : index
    %0 = vector.load %arg1[%c0, %c0_0] : memref<128x512xbf16, #tpu.memory_space<vmem>>, vector<128x512xbf16>
    %c0_1 = arith.constant 0 : index
    %c0_2 = arith.constant 0 : index
    %1 = vector.load %arg2[%c0_1, %c0_2] : memref<512x10xbf16, #tpu.memory_space<vmem>>, vector<512x10xbf16>
    %cst = arith.constant dense<0.000000e+00> : vector<128x10xf32>
    %2 = tpu.matmul %0, %1, %cst {dimension_numbers = #tpu.dot_dimension_numbers<[1], [0], [0], [1], [0, 0, 1, 1], [], []>} : vector<128x512xbf16>, vector<512x10xbf16>, vector<128x10xf32> -> vector<128x10xf32>
    %c0_3 = arith.constant 0 : index
    %c0_4 = arith.constant 0 : index
    %3 = vector.load %arg3[%c0_3, %c0_4] : memref<1x10xf32, #tpu.memory_space<vmem>>, vector<1x10xf32>
    %4 = vector.broadcast %3 : vector<1x10xf32> to vector<128x10xf32>
    %5 = arith.addf %2, %4 : vector<128x10xf32>
    %c0_5 = arith.constant 0 : index
    %c0_6 = arith.constant 0 : index
    %6 = vector.load %arg4[%c0_5, %c0_6] : memref<128x10xf32, #tpu.memory_space<vmem>>, vector<128x10xf32>
    tpu.vector_store %arg4[%c0_5, %c0_6], %5 {strides = array<i32>} : memref<128x10xf32, #tpu.memory_space<vmem>>, vector<128x10xf32>,
    return
  }
  func.func @transform_0(%arg0: i32) -> (i32, i32) {
    %c0_i32 = arith.constant 0 : i32
    %c0_i32_0 = arith.constant 0 : i32
    return %arg0, %c0_i32 : i32, i32
  }
  func.func @transform_1(%arg0: i32) -> (i32, i32) {
    %c0_i32 = arith.constant 0 : i32
    %c0_i32_0 = arith.constant 0 : i32
    %c0_i32_1 = arith.constant 0 : i32
    return %c0_i32, %c0_i32_0 : i32, i32
  }
  func.func @transform_2(%arg0: i32) -> (i32, i32) {
    %c0_i32 = arith.constant 0 : i32
    %c0_i32_0 = arith.constant 0 : i32
    %c0_i32_1 = arith.constant 0 : i32
    return %c0_i32, %c0_i32_0 : i32, i32
  }
  func.func @transform_3(%arg0: i32) -> (i32, i32) {
    %c0_i32 = arith.constant 0 : i32
    %c0_i32_0 = arith.constant 0 : i32
    return %arg0, %c0_i32 : i32, i32
  }
}

</mosaic_0001>

<bundles_post_ra>
// kernel: tpu_custom_call.1
= control target key start
LH: loop header
LB: loop body
LE: loop exit
PB: predicated region body
PF: predicated region fallthrough
CT: control target
= control target key end

     0   :  { %8 = vsyncpa [#allocation3], 0  ;;  %s2103_s0 = inlined_call_operand.hbm [shape: bf16[300,512], index: 0, kind: input, shape index: {}]   ;;  %s2104_s1 = inlined_call_operand.vmem [shape: bf16[512,10], index: 1, kind: input, shape index: {}]   ;;  %s2105_s2 = inlined_call_operand.vmem [shape: f32[1,10], index: 2, kind: input, shape index: {}]   ;;  %s2106_s3 = inlined_call_operand.vmem [shape: f32[300,10], index: 3, kind: output, shape index: {}]  }
   0x1   :  { %10 = vsyncpa [#allocation3 + $0x1], 0  ;;  %s1717_s12 = smov 0   ;;  %s1719_s13 = smov 0  }
   0x2   :  { %s1721_s14 = smov 0   ;;  %s1723_s15 = smov 0  }
   0x3 LB: > { %s1736_s16 = sadd.s32 4294967295, %s1660_s15   ;;  %s1739_s17 = sadd.s32 1, %s1660_s15   ;;  %s1660_s15 = sphi %s1723_s15, %s2115_s15   ;;  %s1656_s14 = sphi %s1721_s14, %s2114_s14   ;;  %s1652_s13 = sphi %s1719_s13, %s2113_s13   ;;  %s1648_s12 = sphi %s1717_s12, %s2112_s12  }
   0x4   : > { %s20_s18 = ssub.s32 %s1660_s15, %s1739_s17  ;;  %s23_s19 = sadd.s32 1, %s1656_s14 }
   0x5   : > { %p21_p0 = scmp.eq.s32.totalorder %s20_s18, 0  ;;  %p30_p1 = scmp.ne.s32.totalorder %s1656_s14, %s1652_s13 }
   0x6   : > { %p31_p2 = scmp.eq.s32.totalorder %s1660_s15, 0  ;;  %p36_p3 = scmp.ne.s32.totalorder %s1652_s13, %s1648_s12 }
   0x7   : > { %s1749_s20 = scalar_select %p21_p0, %s1656_s14, %s23_s19  }
   0x8   : > { %p32_p4 = por %p31_p2, %p30_p1  ;;  %p37_p5 = scmp.eq.s32.totalorder %s1736_s16, 0 }
   0x9   : > { %p102_p6 = scmp.eq.s32.totalorder %s1736_s16, 2  ;;  %p1160_p9 = scmp.ge.s32.totalorder %s1660_s15, 3 }
   0xa   : > { %p1753_p7 = por %p37_p5, %p36_p3 }
   0xb   : > { %p1757_p8 = por %p102_p6, %p30_p1  ;;  %130 = sbr.rel (%p1160_p9) target bundleno = 48 (0x30), region = 24 }
  0x10   : > { %133 = sbr.rel (!%p32_p4) target bundleno = 48 (0x30), region = 28  ;;  %s134_s23 = sand.u32 (%p32_p4), 1, %s1656_s14  }
  0x11   : > { %s1162_s24 = sshll.u32 (%p32_p4), %s1660_s15, 4  ;;  %s1161_s25 = sshll.u32 (%p32_p4), %s134_s23, 8 }
  0x12   : > { %s140_s26 = ssub.s32 (%p32_p4), 38, %s1162_s24  ;;  %s1767_s29 = scalar_lea.sflag (%p32_p4), [#allocation3], %s134_s23 }
  0x13   : > { %p141_p10 = scmp.lt.s32.totalorder (%p32_p4), %s140_s26, 16  ;;  %s138_s30 = scalar_lea.vmem (%p32_p4), [#allocation2], %s1161_s25 }
  0x15   : > { %s2117_s26 = smov (!%p141_p10, %s140_s26), 16 }
  0x16   : > { %s1764_s27 = sshll.u32 %s2117_s26, 8 }
  0x17   : > { %s146_s28 = ssub.s32 4096, %s1764_s27 }
  0x18   : > { %147 = vsyncadd %s1767_s29, %s146_s28  ;;  %p1165_p11 = scmp.ne.s32.totalorder %s1764_s27, 0  ;;  %s1257_s4 = sshll.u32 %s1660_s15, 12 }
  0x19   : > { %s1775_s7 = scalar_lea.hbm %s2103_s0, %s1257_s4  ;;  %s153_s8 = sshll.u32 %s138_s30, 4  ;;  %s1777_s8 = int_to_ptr.vmem [resolvable:$true] %s153_s8 }
  0x1a   : > { %s1568_s9 = scalar_lea.hbm %s1775_s7, %s1764_s27  ;;  %s1572_s12 = scalar_lea.hbm %s2103_s0, 9728 }
  0x1b   : > { %p1569_p12 = scmp.ne.s32.totalorder %s1775_s7, %s1568_s9  ;;  %p1573_p1 = scmp.lt.s32.totalorder %s1775_s7, %s2103_s0 }
  0x1c   : > { %p1574_p2 = scmp.lt.s32.totalorder %s1572_s12, %s1568_s9 }
  0x1d   : > { %p1570_p13 = pnand %p1569_p12, %p1165_p11 }
  0x1e   : > { %p1575_p3 = por %p1574_p2, %p1573_p1 }
  0x1f   : > { %p1571_p0 = pneg %p1570_p13 }
  0x21   : > { %p1576_p4 = pnand %p1575_p3, %p1571_p0 }
  0x23   : > { %1579 = shalt.err (!%p1576_p4)
}
  0x24   : > { %s1580_s23 = scalar_lea.vmem %s1777_s8, %s1764_s27  ;;  %s1694_s24 = smov [#allocation2]  }
  0x25   : > { %p1581_p5 = scmp.ne.s32.totalorder %s1777_s8, %s1580_s23  ;;  %s1584_s25 = sshll.u32 %s1694_s24, 4  ;;  %s1585_s25 = int_to_ptr.vmem [resolvable:$false] %s1584_s25 }
  0x26   : > { %s1586_s26 = scalar_lea.vmem %s1585_s25, 8192  ;;  %p1587_p10 = scmp.lt.s32.totalorder %s1777_s8, %s1585_s25 }
  0x27   : > { %p1582_p6 = pnand %p1581_p5, %p1165_p11  ;;  %p1588_p12 = scmp.lt.s32.totalorder %s1586_s26, %s1580_s23 }
  0x29   : > { %p1583_p9 = pneg %p1582_p6  ;;  %p1589_p13 = por %p1588_p12, %p1587_p10 }
  0x2b   : > { %p1590_p1 = pnand %p1589_p13, %p1583_p9 }
  0x2d   : > { %1593 = shalt.err (!%p1590_p1)
}
  0x2e   : > { %s1695_s28 = smov 256   ;;  %s1696_s30 = smov 16  }
  0x2f   : > { %159 = dma.hbm_to_vmem [thread:$0]  (%p1165_p11), %s1775_s7, %s1764_s27, %s1777_s8, %s1767_s29, %s1695_s28, %s1695_s28, %s1696_s30  }
  0x30 PF: > { %p1170_p0 = scmp.ge.s32.totalorder %s1660_s15, 1  ;;  %p161_p2 = scmp.lt.s32.totalorder %s1660_s15, 4 }
  0x32   : > { %p162_p3 = pnand %p1170_p0, %p161_p2 }
  0x33   : > { %s1806_s4 = sand.u32 (!%p162_p3), 1, %s1652_s13  }
  0x34   : > { %165 = sbr.rel (%p162_p3) target bundleno = 395 (0x18b), region = 32  ;;  %s1171_s5 = sshll.u32 (!%p162_p3), %s1806_s4, 8 }
  0x35   : > { %s168_s6 = scalar_lea.sflag (!%p162_p3), [#allocation3], %s1806_s4  ;;  %s1810_s9 = scalar_lea.vmem (!%p162_p3), [#allocation2], %s1171_s5 }
  0x39   : > { %1643 = dma.done.wait (%p1753_p7), %s168_s6, 4096  }
  0x3a   : > { %1645 = vsyncadd (%p1753_p7), %s168_s6, 4294963200  ;;  %v1488_v0 = vld [vmem:[%s2104_s1 + $0x78] sm:$0xff]   ;;  %v1492_v4 = vld [vmem:[%s2104_s1 + $0x70] sm:$0xff]   ;;  %s1172_s18 = sshll.u32 %s1806_s4, 7  ;;  %vm854_vm0 = vcmask 80896   ;;  %s1239_s4 = sshll.u32 (%p1757_p8), %s1736_s16, 4 }
  0x3b   : > { %v1489_v1 = vld [vmem:[%s2104_s1 + $0xf8] sm:$0xff]   ;;  %1261 = vmatprep.subr.bf16.mxu0 %v1488_v0  ;;  %v1493_v5 = vld [vmem:[%s2104_s1 + $0xf0] sm:$0xff]   ;;  %v1496_v8 = vld [vmem:[%s2104_s1 + $0x68] sm:$0xff]   ;;  %s1258_s19 = sshll.u32 (%p1757_p8), %s1736_s16, 7  ;;  %s879_s23 = ssub.s32 (%p1757_p8), 38, %s1239_s4 }
  0x3c   : > { %v1490_v2 = vld [vmem:[%s2104_s1 + $0x38] sm:$0xff]   ;;  %1325 = vmatprep.subr.bf16.mxu1 %v1489_v1  ;;  %v1494_v6 = vld [vmem:[%s2104_s1 + $0x30] sm:$0xff]   ;;  %v1497_v9 = vld [vmem:[%s2104_s1 + $0xe8] sm:$0xff]   ;;  %s2007_s26 = scalar_lea.vmem (%p1757_p8), %s2106_s3, %s1258_s19   ;;  %p880_p7 = scmp.lt.s32.totalorder (%p1757_p8), %s879_s23, 16 }
  0x3d   : > { %v1491_v3 = vld [vmem:[%s2104_s1 + $0xb8] sm:$0xff]   ;;  %1262 = vmatpush3.bf16.msra.mxu0 %v1490_v2  ;;  %v1495_v7 = vld [vmem:[%s2104_s1 + $0xb0] sm:$0xff]   ;;  %v1498_v10 = vld [vmem:[%s2104_s1 + $0x28] sm:$0xff]  }
  0x3e   : > { %1326 = vmatpush3.bf16.msra.mxu1 %v1491_v3  ;;  %1263 = vmatprep.subr.bf16.mxu0 %v1492_v4  ;;  %v1499_v11 = vld [vmem:[%s2104_s1 + $0xa8] sm:$0xff]   ;;  %v1500_v12 = vld [vmem:[%s2104_s1 + $0x60] sm:$0xff]   ;;  %v1504_v16 = vld [vmem:[%s2104_s1 + $0x58] sm:$0xff]  }
  0x3f   : > { %1327 = vmatprep.subr.bf16.mxu1 %v1493_v5  ;;  %v1501_v13 = vld [vmem:[%s2104_s1 + $0xe0] sm:$0xff]   ;;  %v1505_v17 = vld [vmem:[%s2104_s1 + $0xd8] sm:$0xff]   ;;  %v1508_v20 = vld [vmem:[%s2104_s1 + $0x50] sm:$0xff]  }
  0x40   : > { %v1502_v14 = vld [vmem:[%s2104_s1 + $0x20] sm:$0xff]   ;;  %v1506_v18 = vld [vmem:[%s2104_s1 + $0x18] sm:$0xff]   ;;  %v1509_v21 = vld [vmem:[%s2104_s1 + $0xd0] sm:$0xff]  }
  0x41   : > { %1264 = vmatpush3.bf16.msra.mxu0 %v1494_v6  ;;  %v1503_v15 = vld [vmem:[%s2104_s1 + $0xa0] sm:$0xff]   ;;  %v1507_v19 = vld [vmem:[%s2104_s1 + $0x98] sm:$0xff]   ;;  %v1510_v22 = vld [vmem:[%s2104_s1 + $0x10] sm:$0xff]  }
  0x42   : > { %1328 = vmatpush3.bf16.msra.mxu1 %v1495_v7  ;;  %1265 = vmatprep.subr.bf16.mxu0 %v1496_v8  ;;  %v1511_v23 = vld [vmem:[%s2104_s1 + $0x90] sm:$0xff]   ;;  %v1512_v24 = vld [vmem:[%s2104_s1 + $0x48] sm:$0xff]   ;;  %v1516_v28 = vld [vmem:[%s2104_s1 + $0x40] sm:$0xff]  }
  0x43   : > { %1329 = vmatprep.subr.bf16.mxu1 %v1497_v9  ;;  %v1513_v25 = vld [vmem:[%s2104_s1 + $0xc8] sm:$0xff]   ;;  %v1517_v29 = vld [vmem:[%s2104_s1 + $0xc0] sm:$0xff]  }
  0x44   : > { %v1514_v26 = vld [vmem:[%s2104_s1 + $0x8] sm:$0xff]   ;;  %v1518_v30 = vld [vmem:[%s2104_s1] sm:$0xff]  }
  0x45   : > { %1266 = vmatpush3.bf16.msra.mxu0 %v1498_v10  ;;  %v1515_v27 = vld [vmem:[%s2104_s1 + $0x88] sm:$0xff]   ;;  %v1519_v31 = vld [vmem:[%s2104_s1 + $0x80] sm:$0xff]  }
  0x46   : > { %1330 = vmatpush3.bf16.msra.mxu1 %v1499_v11  ;;  %1267 = vmatprep.subr.bf16.mxu0 %v1500_v12  ;;  %v1520_v32 = vld [vmem:[%s1810_s9] ss:$16 sps:$4 sm:$0xff]   ;;  %v1522_v33 = vld [vmem:[%s1810_s9 + $0x4] ss:$16 sps:$4 sm:$0xff]   ;;  %v1523_v34 = vld [vmem:[%s1810_s9 + $0x8] ss:$16 sps:$4 sm:$0xff]  }
  0x47   : > { %1331 = vmatprep.subr.bf16.mxu1 %v1501_v13  ;;  %v1525_v35 = vld [vmem:[%s1810_s9 + $0xc] ss:$16 sps:$4 sm:$0xff]   ;;  %692 = vmatprep.mubr.bf16.mxu0 %v1522_v33  ;;  %v1526_v36 = vld [vmem:[%s1810_s9 + $0x24] ss:$16 sps:$4 sm:$0xff]   ;;  %v1530_v38 = vld [vmem:[%s1810_s9 + $0x20] ss:$16 sps:$4 sm:$0xff]  }
  0x48   : > { %789 = vmatprep.mubr.bf16.mxu1 %v1525_v35  ;;  %v1528_v37 = vld [vmem:[%s1810_s9 + $0x2c] ss:$16 sps:$4 sm:$0xff]   ;;  %v1531_v39 = vld [vmem:[%s1810_s9 + $0x28] ss:$16 sps:$4 sm:$0xff]   ;;  %v1532_v40 = vld [vmem:[%s1810_s9 + $0x44] ss:$16 sps:$4 sm:$0xff]  }
  0x49   : > { %1268 = vmatpush3.bf16.msra.mxu0 %v1502_v14  ;;  %v1534_v41 = vld [vmem:[%s1810_s9 + $0x4c] ss:$16 sps:$4 sm:$0xff]   ;;  %v1536_v42 = vld [vmem:[%s1810_s9 + $0x40] ss:$16 sps:$4 sm:$0xff]   ;;  %v1537_v43 = vld [vmem:[%s1810_s9 + $0x48] ss:$16 sps:$4 sm:$0xff]  }
  0x4a   : > { %1332 = vmatpush3.bf16.msra.mxu1 %v1503_v15  ;;  %1269 = vmatprep.subr.bf16.mxu0 %v1504_v16  ;;  %v1538_v44 = vld [vmem:[%s1810_s9 + $0x64] ss:$16 sps:$4 sm:$0xff]   ;;  %v1540_v45 = vld [vmem:[%s1810_s9 + $0x6c] ss:$16 sps:$4 sm:$0xff]   ;;  %v1542_v46 = vld [vmem:[%s1810_s9 + $0x60] ss:$16 sps:$4 sm:$0xff]  }
  0x4b   : > { %1333 = vmatprep.subr.bf16.mxu1 %v1505_v17  ;;  %v1543_v47 = vld [vmem:[%s1810_s9 + $0x68] ss:$16 sps:$4 sm:$0xff]   ;;  %v1544_v48 = vld [vmem:[%s1810_s9 + $0x84] ss:$16 sps:$4 sm:$0xff]   ;;  %v1546_v49 = vld [vmem:[%s1810_s9 + $0x8c] ss:$16 sps:$4 sm:$0xff]  }
  0x4c   : > { %v1548_v50 = vld [vmem:[%s1810_s9 + $0x80] ss:$16 sps:$4 sm:$0xff]   ;;  %v1549_v51 = vld [vmem:[%s1810_s9 + $0x88] ss:$16 sps:$4 sm:$0xff]   ;;  %v1550_v52 = vld [vmem:[%s1810_s9 + $0xa4] ss:$16 sps:$4 sm:$0xff]  }
  0x4d   : > { %1270 = vmatpush3.bf16.msra.mxu0 %v1506_v18  ;;  %v1552_v53 = vld [vmem:[%s1810_s9 + $0xac] ss:$16 sps:$4 sm:$0xff]   ;;  %v1554_v54 = vld [vmem:[%s1810_s9 + $0xa0] ss:$16 sps:$4 sm:$0xff]   ;;  %v1555_v55 = vld [vmem:[%s1810_s9 + $0xa8] ss:$16 sps:$4 sm:$0xff]  }
  0x4e   : > { %1334 = vmatpush3.bf16.msra.mxu1 %v1507_v19  ;;  %1271 = vmatprep.subr.bf16.mxu0 %v1508_v20  ;;  %v1556_v56 = vld [vmem:[%s1810_s9 + $0xc4] ss:$16 sps:$4 sm:$0xff]   ;;  %v1558_v57 = vld [vmem:[%s1810_s9 + $0xcc] ss:$16 sps:$4 sm:$0xff]   ;;  %v1560_v58 = vld [vmem:[%s1810_s9 + $0xc0] ss:$16 sps:$4 sm:$0xff]  }
  0x4f   : > { %1335 = vmatprep.subr.bf16.mxu1 %v1509_v21  ;;  %v1561_v59 = vld [vmem:[%s1810_s9 + $0xc8] ss:$16 sps:$4 sm:$0xff]   ;;  %v1562_v60 = vld [vmem:[%s1810_s9 + $0xe4] ss:$16 sps:$4 sm:$0xff]   ;;  %v1564_v61 = vld [vmem:[%s1810_s9 + $0xec] ss:$16 sps:$4 sm:$0xff]  }
  0x50   : > { %v1566_v62 = vld [vmem:[%s1810_s9 + $0xe0] ss:$16 sps:$4 sm:$0xff]   ;;  %v1567_v63 = vld [vmem:[%s1810_s9 + $0xe8] ss:$16 sps:$4 sm:$0xff]   ;;  %s1951_s9 = scalar_lea.vmem [#allocation4], %s1172_s18  }
  0x51   : > { %1272 = vmatpush3.bf16.msra.mxu0 %v1510_v22  ;;  %v1947_v2 = vld [vmem:[%s2105_s2] ss:$0 sm:$0xff] }
  0x52   : > { %1336 = vmatpush3.bf16.msra.mxu1 %v1511_v23  ;;  %1273 = vmatprep.subr.bf16.mxu0 %v1512_v24 }
  0x53   : > { %1337 = vmatprep.subr.bf16.mxu1 %v1513_v25 }
  0x55   : > { %1274 = vmatpush3.bf16.msra.mxu0 %v1514_v26 }
  0x56   : > { %1338 = vmatpush3.bf16.msra.mxu1 %v1515_v27  ;;  %1275 = vmatprep.subr.bf16.mxu0 %v1516_v28 }
  0x57   : > { %1339 = vmatprep.subr.bf16.mxu1 %v1517_v29 }
  0x59   : > { %1276 = vmatpush3.bf16.msra.mxu0 %v1518_v30 }
  0x5a   : > { %1340 = vmatpush3.bf16.msra.mxu1 %v1519_v31 }
  0x5c   : > { %693 = vmatmul.mubr.bf16.vlgmr.msra.gmra.mxu0 %v1520_v32 }
  0x5d   : > { %790 = vmatmul.mubr.bf16.vlgmr.msra.gmra.mxu1 %v1523_v34  ;;  %700 = vmatprep.mubr.bf16.mxu0 %v1526_v36 }
  0x5e   : > { %797 = vmatprep.mubr.bf16.mxu1 %v1528_v37 }
  0x64   : > { %701 = vmatmul.mubr.bf16.gmra.mxu0 %v1530_v38 }
  0x65   : > { %798 = vmatmul.mubr.bf16.gmra.mxu1 %v1531_v39  ;;  %708 = vmatprep.mubr.bf16.mxu0 %v1532_v40 }
  0x66   : > { %805 = vmatprep.mubr.bf16.mxu1 %v1534_v41 }
  0x6c   : > { %709 = vmatmul.mubr.bf16.gmra.mxu0 %v1536_v42 }
  0x6d   : > { %806 = vmatmul.mubr.bf16.gmra.mxu1 %v1537_v43  ;;  %716 = vmatprep.mubr.bf16.mxu0 %v1538_v44 }
  0x6e   : > { %813 = vmatprep.mubr.bf16.mxu1 %v1540_v45 }
  0x74   : > { %717 = vmatmul.mubr.bf16.gmra.mxu0 %v1542_v46 }
  0x75   : > { %814 = vmatmul.mubr.bf16.gmra.mxu1 %v1543_v47  ;;  %724 = vmatprep.mubr.bf16.mxu0 %v1544_v48 }
  0x76   : > { %821 = vmatprep.mubr.bf16.mxu1 %v1546_v49 }
  0x7c   : > { %725 = vmatmul.mubr.bf16.gmra.mxu0 %v1548_v50 }
  0x7d   : > { %822 = vmatmul.mubr.bf16.gmra.mxu1 %v1549_v51  ;;  %732 = vmatprep.mubr.bf16.mxu0 %v1550_v52 }
  0x7e   : > { %829 = vmatprep.mubr.bf16.mxu1 %v1552_v53 }
  0x84   : > { %733 = vmatmul.mubr.bf16.gmra.mxu0 %v1554_v54 }
  0x85   : > { %830 = vmatmul.mubr.bf16.gmra.mxu1 %v1555_v55  ;;  %740 = vmatprep.mubr.bf16.mxu0 %v1556_v56 }
  0x86   : > { %837 = vmatprep.mubr.bf16.mxu1 %v1558_v57 }
  0x8c   : > { %741 = vmatmul.mubr.bf16.gmra.mxu0 %v1560_v58 }
  0x8d   : > { %838 = vmatmul.mubr.bf16.gmra.mxu1 %v1561_v59  ;;  %748 = vmatprep.mubr.bf16.mxu0 %v1562_v60 }
  0x8e   : > { %845 = vmatprep.mubr.bf16.mxu1 %v1564_v61 }
  0x94   : > { %749 = vmatmul.mubr.bf16.gmra.mxu0 %v1566_v62 }
  0x95   : > { %846 = vmatmul.mubr.bf16.gmra.mxu1 %v1567_v63 }
 0x11c   : > { %v1277_v0 = vpop.f32.mrf.mxu0 }
 0x11d   : > { %v1341_v1 = vpop.f32.mrf.mxu1 }
 0x11e   : > { %v1278_v3 = vpop.f32.mrf.mxu0 }
 0x11f   : > { %v1279_v4 = vadd.f32 %v1278_v3, %v1277_v0  ;;  %v1342_v5 = vpop.f32.mrf.mxu1 }
 0x120   : > { %v1280_v6 = vpop.f32.mrf.mxu0  ;;  %v1343_v8 = vadd.f32 %v1342_v5, %v1341_v1 }
 0x121   : > { %v695_v7 = vadd.f32 %v1279_v4, %v1947_v2  ;;  %v1344_v9 = vpop.f32.mrf.mxu1 }
 0x122   : > { %v1281_v10 = vpop.f32.mrf.mxu0 }
 0x123   : > { %v792_v11 = vadd.f32 %v1343_v8, %v695_v7  ;;  %v1282_v12 = vadd.f32 %v1281_v10, %v1280_v6  ;;  %v1345_v13 = vpop.f32.mrf.mxu1 }
 0x124   : > { %v1283_v14 = vpop.f32.mrf.mxu0  ;;  %v1346_v16 = vadd.f32 %v1345_v13, %v1344_v9 }
 0x125   : > { %855 = vst.msk [vmem:[%s1951_s9] sm:$0xff] %vm854_vm0, %v792_v11  ;;  %v698_v15 = vadd.f32 %v1282_v12, %v1947_v2  ;;  %v1347_v17 = vpop.f32.mrf.mxu1 }
 0x126   : > { %v1284_v18 = vpop.f32.mrf.mxu0 }
 0x127   : > { %v795_v19 = vadd.f32 %v1346_v16, %v698_v15  ;;  %v1285_v20 = vadd.f32 %v1284_v18, %v1283_v14  ;;  %v1348_v21 = vpop.f32.mrf.mxu1 }
 0x128   : > { %v1286_v22 = vpop.f32.mrf.mxu0  ;;  %v1349_v24 = vadd.f32 %v1348_v21, %v1347_v17 }
 0x129   : > { %856 = vst.msk [vmem:[%s1951_s9 + $0x8] sm:$0xff] %vm854_vm0, %v795_v19  ;;  %v703_v23 = vadd.f32 %v1285_v20, %v1947_v2  ;;  %v1350_v25 = vpop.f32.mrf.mxu1 }
 0x12a   : > { %v1287_v26 = vpop.f32.mrf.mxu0 }
 0x12b   : > { %v800_v27 = vadd.f32 %v1349_v24, %v703_v23  ;;  %v1288_v28 = vadd.f32 %v1287_v26, %v1286_v22  ;;  %v1351_v29 = vpop.f32.mrf.mxu1 }
 0x12c   : > { %v1289_v30 = vpop.f32.mrf.mxu0  ;;  %v1352_v32 = vadd.f32 %v1351_v29, %v1350_v25 }
 0x12d   : > { %857 = vst.msk [vmem:[%s1951_s9 + $0x10] sm:$0xff] %vm854_vm0, %v800_v27  ;;  %v706_v31 = vadd.f32 %v1288_v28, %v1947_v2  ;;  %v1353_v33 = vpop.f32.mrf.mxu1 }
 0x12e   : > { %v1290_v34 = vpop.f32.mrf.mxu0 }
 0x12f   : > { %v803_v35 = vadd.f32 %v1352_v32, %v706_v31  ;;  %v1291_v36 = vadd.f32 %v1290_v34, %v1289_v30  ;;  %v1354_v37 = vpop.f32.mrf.mxu1 }
 0x130   : > { %v1292_v38 = vpop.f32.mrf.mxu0  ;;  %v1355_v40 = vadd.f32 %v1354_v37, %v1353_v33 }
 0x131   : > { %858 = vst.msk [vmem:[%s1951_s9 + $0x18] sm:$0xff] %vm854_vm0, %v803_v35  ;;  %v711_v39 = vadd.f32 %v1291_v36, %v1947_v2  ;;  %v1356_v41 = vpop.f32.mrf.mxu1 }
 0x132   : > { %v1293_v42 = vpop.f32.mrf.mxu0 }
 0x133   : > { %v808_v43 = vadd.f32 %v1355_v40, %v711_v39  ;;  %v1294_v44 = vadd.f32 %v1293_v42, %v1292_v38  ;;  %v1357_v45 = vpop.f32.mrf.mxu1 }
 0x134   : > { %v1295_v46 = vpop.f32.mrf.mxu0  ;;  %v1358_v48 = vadd.f32 %v1357_v45, %v1356_v41 }
 0x135   : > { %859 = vst.msk [vmem:[%s1951_s9 + $0x20] sm:$0xff] %vm854_vm0, %v808_v43  ;;  %v714_v47 = vadd.f32 %v1294_v44, %v1947_v2  ;;  %v1359_v49 = vpop.f32.mrf.mxu1 }
 0x136   : > { %v1296_v50 = vpop.f32.mrf.mxu0 }
 0x137   : > { %v811_v51 = vadd.f32 %v1358_v48, %v714_v47  ;;  %v1297_v52 = vadd.f32 %v1296_v50, %v1295_v46  ;;  %v1360_v53 = vpop.f32.mrf.mxu1 }
 0x138   : > { %v1298_v54 = vpop.f32.mrf.mxu0  ;;  %v1361_v56 = vadd.f32 %v1360_v53, %v1359_v49 }
 0x139   : > { %860 = vst.msk [vmem:[%s1951_s9 + $0x28] sm:$0xff] %vm854_vm0, %v811_v51  ;;  %v719_v55 = vadd.f32 %v1297_v52, %v1947_v2  ;;  %v1362_v57 = vpop.f32.mrf.mxu1 }
 0x13a   : > { %v1299_v58 = vpop.f32.mrf.mxu0 }
 0x13b   : > { %v816_v59 = vadd.f32 %v1361_v56, %v719_v55  ;;  %v1300_v60 = vadd.f32 %v1299_v58, %v1298_v54  ;;  %v1363_v61 = vpop.f32.mrf.mxu1 }
 0x13c   : > { %v1301_v62 = vpop.f32.mrf.mxu0  ;;  %v1364_v0 = vadd.f32 %v1363_v61, %v1362_v57 }
 0x13d   : > { %861 = vst.msk [vmem:[%s1951_s9 + $0x30] sm:$0xff] %vm854_vm0, %v816_v59  ;;  %v722_v63 = vadd.f32 %v1300_v60, %v1947_v2  ;;  %v1365_v1 = vpop.f32.mrf.mxu1 }
 0x13e   : > { %v1302_v3 = vpop.f32.mrf.mxu0 }
 0x13f   : > { %v819_v4 = vadd.f32 %v1364_v0, %v722_v63  ;;  %v1303_v5 = vadd.f32 %v1302_v3, %v1301_v62  ;;  %v1366_v6 = vpop.f32.mrf.mxu1 }
 0x140   : > { %v1304_v7 = vpop.f32.mrf.mxu0  ;;  %v1367_v9 = vadd.f32 %v1366_v6, %v1365_v1 }
 0x141   : > { %862 = vst.msk [vmem:[%s1951_s9 + $0x38] sm:$0xff] %vm854_vm0, %v819_v4  ;;  %v727_v8 = vadd.f32 %v1303_v5, %v1947_v2  ;;  %v1368_v10 = vpop.f32.mrf.mxu1 }
 0x142   : > { %v1305_v11 = vpop.f32.mrf.mxu0 }
 0x143   : > { %v824_v12 = vadd.f32 %v1367_v9, %v727_v8  ;;  %v1306_v13 = vadd.f32 %v1305_v11, %v1304_v7  ;;  %v1369_v14 = vpop.f32.mrf.mxu1 }
 0x144   : > { %v1307_v15 = vpop.f32.mrf.mxu0  ;;  %v1370_v17 = vadd.f32 %v1369_v14, %v1368_v10 }
 0x145   : > { %863 = vst.msk [vmem:[%s1951_s9 + $0x40] sm:$0xff] %vm854_vm0, %v824_v12  ;;  %v730_v16 = vadd.f32 %v1306_v13, %v1947_v2  ;;  %v1371_v18 = vpop.f32.mrf.mxu1 }
 0x146   : > { %v1308_v19 = vpop.f32.mrf.mxu0 }
 0x147   : > { %v827_v20 = vadd.f32 %v1370_v17, %v730_v16  ;;  %v1309_v21 = vadd.f32 %v1308_v19, %v1307_v15  ;;  %v1372_v22 = vpop.f32.mrf.mxu1 }
 0x148   : > { %v1310_v23 = vpop.f32.mrf.mxu0  ;;  %v1373_v25 = vadd.f32 %v1372_v22, %v1371_v18 }
 0x149   : > { %864 = vst.msk [vmem:[%s1951_s9 + $0x48] sm:$0xff] %vm854_vm0, %v827_v20  ;;  %v735_v24 = vadd.f32 %v1309_v21, %v1947_v2  ;;  %v1374_v26 = vpop.f32.mrf.mxu1 }
 0x14a   : > { %v1311_v27 = vpop.f32.mrf.mxu0 }
 0x14b   : > { %v832_v28 = vadd.f32 %v1373_v25, %v735_v24  ;;  %v1312_v29 = vadd.f32 %v1311_v27, %v1310_v23  ;;  %v1375_v30 = vpop.f32.mrf.mxu1 }
 0x14c   : > { %v1313_v31 = vpop.f32.mrf.mxu0  ;;  %v1376_v33 = vadd.f32 %v1375_v30, %v1374_v26 }
 0x14d   : > { %865 = vst.msk [vmem:[%s1951_s9 + $0x50] sm:$0xff] %vm854_vm0, %v832_v28  ;;  %v738_v32 = vadd.f32 %v1312_v29, %v1947_v2  ;;  %v1377_v34 = vpop.f32.mrf.mxu1 }
 0x14e   : > { %v1314_v35 = vpop.f32.mrf.mxu0 }
 0x14f   : > { %v835_v36 = vadd.f32 %v1376_v33, %v738_v32  ;;  %v1315_v37 = vadd.f32 %v1314_v35, %v1313_v31  ;;  %v1378_v38 = vpop.f32.mrf.mxu1 }
 0x150   : > { %v1316_v39 = vpop.f32.mrf.mxu0  ;;  %v1379_v41 = vadd.f32 %v1378_v38, %v1377_v34 }
 0x151   : > { %866 = vst.msk [vmem:[%s1951_s9 + $0x58] sm:$0xff] %vm854_vm0, %v835_v36  ;;  %v743_v40 = vadd.f32 %v1315_v37, %v1947_v2  ;;  %v1380_v42 = vpop.f32.mrf.mxu1 }
 0x152   : > { %v1317_v43 = vpop.f32.mrf.mxu0 }
 0x153   : > { %v840_v44 = vadd.f32 %v1379_v41, %v743_v40  ;;  %v1318_v45 = vadd.f32 %v1317_v43, %v1316_v39  ;;  %v1381_v46 = vpop.f32.mrf.mxu1 }
 0x154   : > { %v1319_v47 = vpop.f32.mrf.mxu0  ;;  %v1382_v49 = vadd.f32 %v1381_v46, %v1380_v42 }
 0x155   : > { %867 = vst.msk [vmem:[%s1951_s9 + $0x60] sm:$0xff] %vm854_vm0, %v840_v44  ;;  %v746_v48 = vadd.f32 %v1318_v45, %v1947_v2  ;;  %v1383_v50 = vpop.f32.mrf.mxu1 }
 0x156   : > { %v1320_v51 = vpop.f32.mrf.mxu0 }
 0x157   : > { %v843_v52 = vadd.f32 %v1382_v49, %v746_v48  ;;  %v1321_v53 = vadd.f32 %v1320_v51, %v1319_v47  ;;  %v1384_v54 = vpop.f32.mrf.mxu1 }
 0x158   : > { %v1322_v55 = vpop.f32.mrf.mxu0  ;;  %v1385_v57 = vadd.f32 %v1384_v54, %v1383_v50 }
 0x159   : > { %868 = vst.msk [vmem:[%s1951_s9 + $0x68] sm:$0xff] %vm854_vm0, %v843_v52  ;;  %v751_v56 = vadd.f32 %v1321_v53, %v1947_v2  ;;  %v1386_v58 = vpop.f32.mrf.mxu1 }
 0x15a   : > { %v1323_v59 = vpop.f32.mrf.mxu0 }
 0x15b   : > { %v848_v60 = vadd.f32 %v1385_v57, %v751_v56  ;;  %v1324_v61 = vadd.f32 %v1323_v59, %v1322_v55  ;;  %v1387_v62 = vpop.f32.mrf.mxu1 }
 0x15c   : > { %v1388_v0 = vadd.f32 %v1387_v62, %v1386_v58 }
 0x15d   : > { %869 = vst.msk [vmem:[%s1951_s9 + $0x70] sm:$0xff] %vm854_vm0, %v848_v60  ;;  %v754_v63 = vadd.f32 %v1324_v61, %v1947_v2  ;;  %877 = sbr.rel (!%p1757_p8) target bundleno = 395 (0x18b), region = 40 }
 0x15f   : > { %v851_v1 = vadd.f32 %v1388_v0, %v754_v63 }
 0x161   : > { %870 = vst.msk [vmem:[%s1951_s9 + $0x78] sm:$0xff] %vm854_vm0, %v851_v1 }
 0x162   : > { %s2119_s23 = smov (!%p880_p7, %s879_s23), 16 }
 0x163   : > { %s1240_s28 = sshll.u32 %s2119_s23, 7 }
 0x164   : > { %p1243_p11 = scmp.eq.s32.totalorder %s1240_s28, 0 }
 0x165   : > { %s2013_s22 = sshrl.u32 (!%p1243_p11), %s2119_s23, 4 }
 0x166   : > { %888 = sbr.rel (%p1243_p11) target bundleno = 395 (0x18b), region = 44  ;;  %p1244_p8 = scmp.le.s32.totalorder (!%p1243_p11), %s2013_s22, 0 }
 0x16b   : > { %1111 = sbr.rel (%p1244_p8) target bundleno = 378 (0x17a), region = 126  ;;  %s2109_s16 = smov (!%p1244_p8), %s2007_s26 }
 0x16c   : > { %s2110_s30 = smov (!%p1244_p8), %s1951_s9  ;;  %s2022_s5 = smov (!%p1244_p8), 0  }
 0x16d   : > { %s2024_s6 = smov (!%p1244_p8), 0  }
 0x170 LB: >> { %v981_v2 = vld [vmem:[%s1668_s30] sm:$0xff]  ;;  %v983_v3 = vld [vmem:[%s1668_s30 + $0x8] sm:$0xff]  ;;  %v985_v4 = vld [vmem:[%s1668_s30 + $0x10] sm:$0xff]  ;;  %s1013_s27 = sadd.s32 1, %s1672_s5  ;;  %s975_s6 = sadd.s32 1, %s1676_s6   ;;  %s1676_s6 = sphi %s2024_s6, %s975_s6   ;;  %s1672_s5 = sphi %s2022_s5, %s2111_s5   ;;  %s1668_s30 = sphi %s2110_s30, %s1018_s30   ;;  %s1664_s16 = sphi %s2109_s16, %s1019_s16  }
 0x171   : >> { %982 = vst [vmem:[%s1664_s16] sm:$0xff] %v981_v2  ;;  %984 = vst [vmem:[%s1664_s16 + $0x8] sm:$0xff] %v983_v3  ;;  %v987_v5 = vld [vmem:[%s1668_s30 + $0x18] sm:$0xff]  ;;  %v989_v6 = vld [vmem:[%s1668_s30 + $0x20] sm:$0xff]  ;;  %p1014_p4 = scmp.ge.s32.totalorder %s1013_s27, %s2013_s22  ;;  %p974_p5 = scmp.ge.s32.totalorder %s975_s6, %s2013_s22 }
 0x172   : >> { %986 = vst [vmem:[%s1664_s16 + $0x10] sm:$0xff] %v985_v4  ;;  %v991_v7 = vld [vmem:[%s1668_s30 + $0x28] sm:$0xff]  ;;  %988 = vst [vmem:[%s1664_s16 + $0x18] sm:$0xff] %v987_v5  ;;  %v993_v8 = vld [vmem:[%s1668_s30 + $0x30] sm:$0xff] }
 0x173   : >> { %990 = vst [vmem:[%s1664_s16 + $0x20] sm:$0xff] %v989_v6  ;;  %992 = vst [vmem:[%s1664_s16 + $0x28] sm:$0xff] %v991_v7  ;;  %v995_v9 = vld [vmem:[%s1668_s30 + $0x38] sm:$0xff]  ;;  %v997_v10 = vld [vmem:[%s1668_s30 + $0x40] sm:$0xff]  ;;  %s2121_s27 = smov (%p1014_p4, %s1013_s27), 0 }
 0x174   : >> { %994 = vst [vmem:[%s1664_s16 + $0x30] sm:$0xff] %v993_v8  ;;  %996 = vst [vmem:[%s1664_s16 + $0x38] sm:$0xff] %v995_v9  ;;  %v999_v11 = vld [vmem:[%s1668_s30 + $0x48] sm:$0xff]  ;;  %v1001_v12 = vld [vmem:[%s1668_s30 + $0x50] sm:$0xff]  ;;  %s1245_s29 = sshll.u32 %s2121_s27, 7  ;;  %s2111_s5 = smov %s2121_s27 }
 0x175   : >> { %998 = vst [vmem:[%s1664_s16 + $0x40] sm:$0xff] %v997_v10  ;;  %v1003_v13 = vld [vmem:[%s1668_s30 + $0x58] sm:$0xff]  ;;  %1000 = vst [vmem:[%s1664_s16 + $0x48] sm:$0xff] %v999_v11  ;;  %v1005_v14 = vld [vmem:[%s1668_s30 + $0x60] sm:$0xff]  ;;  %977 = sbr.rel (!%p974_p5) target bundleno = 368 (0x170), region = 132 }
 0x176   : >> { %1002 = vst [vmem:[%s1664_s16 + $0x50] sm:$0xff] %v1001_v12  ;;  %1004 = vst [vmem:[%s1664_s16 + $0x58] sm:$0xff] %v1003_v13  ;;  %v1007_v15 = vld [vmem:[%s1668_s30 + $0x68] sm:$0xff]  ;;  %v1009_v16 = vld [vmem:[%s1668_s30 + $0x70] sm:$0xff] }
 0x177   : >> { %1006 = vst [vmem:[%s1664_s16 + $0x60] sm:$0xff] %v1005_v14  ;;  %1008 = vst [vmem:[%s1664_s16 + $0x68] sm:$0xff] %v1007_v15  ;;  %v1011_v17 = vld [vmem:[%s1668_s30 + $0x78] sm:$0xff]  ;;  %s1018_s30 = scalar_lea.vmem %s1951_s9, %s1245_s29 [#allocation4]  }
 0x178   : >> { %1010 = vst [vmem:[%s1664_s16 + $0x70] sm:$0xff] %v1009_v16  ;;  %1012 = vst [vmem:[%s1664_s16 + $0x78] sm:$0xff] %v1011_v17  ;;  %s1019_s16 = scalar_lea.vmem %s2007_s26, %s1245_s29  }
 0x17a PF: > { %s2082_s15 = sand.u32 15, %s2119_s23   ;;  %s1259_s7 = sshll.u32 %s2013_s22, 7 }
 0x17b   : > { %s1024_s8 = scalar_lea.vmem %s1951_s9, %s1259_s7 [#allocation4]   ;;  %s1026_s10 = scalar_lea.vmem %s2007_s26, %s1259_s7  }
 0x17c   : > { %p1250_p6 = scmp.le.s32.totalorder %s2082_s15, 0 }
 0x17d   : > { %s1678_s11 = smov (!%p1250_p6), %s1026_s10   ;;  %s1682_s12 = smov (!%p1250_p6), %s1024_s8  }
 0x17e   : > { %1125 = sbr.rel (%p1250_p6) target bundleno = 395 (0x18b), region = 137  ;;  %s1686_s21 = smov (!%p1250_p6), 0  }
 0x17f   : > { %s1690_s18 = smov (!%p1250_p6), 0  }
 0x183 LB: >> { %v1036_v18 = vld [vmem:[%s1684_s12] sm:$0xff]  ;;  %s1038_s4 = sadd.s32 1, %s1688_s21  ;;  %s1030_s18 = sadd.s32 1, %s1692_s18   ;;  %s1692_s18 = sphi %s1690_s18, %s1030_s18   ;;  %s1688_s21 = sphi %s1686_s21, %s1687_s21   ;;  %s1684_s12 = sphi %s1682_s12, %s1043_s12   ;;  %s1680_s11 = sphi %s1678_s11, %s1044_s11  }
 0x184   : >> { %1037 = vst [vmem:[%s1680_s11] sm:$0xff] %v1036_v18  ;;  %p1039_p9 = scmp.ge.s32.totalorder %s1038_s4, %s2082_s15  ;;  %p1029_p10 = scmp.ge.s32.totalorder %s1030_s18, %s2082_s15 }
 0x186   : >> { %s2123_s4 = smov (%p1039_p9, %s1038_s4), 0  ;;  %1032 = sbr.rel (!%p1029_p10) target bundleno = 387 (0x183), region = 143 }
 0x187   : >> { %s1251_s9 = sshll.u32 %s2123_s4, 3  ;;  %s1687_s21 = smov %s2123_s4  }
 0x188   : >> { %s1043_s12 = scalar_lea.vmem %s1024_s8, %s1251_s9 [#allocation4]   ;;  %s1044_s11 = scalar_lea.vmem %s1026_s10, %s1251_s9  }
 0x18b PF: > { %p13_p12 = scmp.ge.s32.totalorder %s1739_s17, 5   ;;  %s2112_s12 = smov %s1652_s13 }
 0x18c   : > { %s2113_s13 = smov %s1656_s14  ;;  %s2114_s14 = smov %s1749_s20 }
 0x18d   : > { %s2115_s15 = smov %s1739_s17  ;;  %15 = sbr.rel (!%p13_p12) target bundleno = 3 (0x3), region = 154 }
 0x192   :  { %1060 = vsyncpa [#allocation3], 1 }
 0x193   :  { %1062 = vsyncpa [#allocation3 + $0x1], 1 }

</bundles_post_ra>
